<compile_context>
chip_gen: v6e
topology: v6e:2x2x1
jax: 0.10.0
libtpu: 0.0.40
codegen_flags: <defaults>
</compile_context>

<pallas_src>
import jax
import jax.numpy as jnp
from jax.experimental import pallas as pl
from jax.experimental.pallas import tpu as pltpu


def _pick_spatial_tile(hw, t_max=4096):
    """Largest multiple of 128 that divides hw (capped at t_max), else hw."""
    t = (min(t_max, hw) // 128) * 128
    while t >= 128:
        if hw % t == 0:
            return t
        t -= 128
    return hw  # hw < 128 or no multiple-of-128 divisor: use the full row


def relu_conv_stats_kernel(x_ref, w_ref, sum_ref, ssq_ref):
    """ReLU + 1x1 conv (as (C_mid,C_in)@(C_in,T) matmul) + BN batch-stat
    accumulation.  Grid = (batch, spatial-tiles); the stats accumulators are
    revisited only across the (arbitrary) spatial axis and are indexed by the
    batch axis, so marking batch "parallel" cannot race across TensorCores."""
    @pl.when(pl.program_id(1) == 0)
    def _():
        sum_ref[...] = jnp.zeros_like(sum_ref)
        ssq_ref[...] = jnp.zeros_like(ssq_ref)

    xr = jnp.maximum(x_ref[...], 0.0)                                 # (C_in, T)
    y = jnp.dot(w_ref[...], xr, preferred_element_type=jnp.float32)   # (C_mid, T)
    sum_ref[...] += jnp.sum(y, axis=1, keepdims=True)
    ssq_ref[...] += jnp.sum(y * y, axis=1, keepdims=True)


def relu_conv_bn_kernel(x_ref, w_ref, scale_ref, bias_ref, o_ref):
    """Recompute ReLU + 1x1 conv (K = C_in is tiny) and apply the folded BN
    affine.  Output block is (C_mid, T) with T a multiple of 128 ->
    lane-dense, unmasked stores."""
    xr = jnp.maximum(x_ref[...], 0.0)                                 # (C_in, T)
    y = jnp.dot(w_ref[...], xr, preferred_element_type=jnp.float32)   # (C_mid, T)
    o_ref[...] = (y * scale_ref[...] + bias_ref[...]).astype(o_ref.dtype)


def pixel_shuffle_layer(x_nchw, conv_w, gamma, beta, upscale_factor,
                        eps=1e-5, t_max=4096):
    N, C_in, H, W = x_nchw.shape
    C_mid = conv_w.shape[0]                 # = C_out * r^2
    r = upscale_factor
    C_out = C_mid // (r * r)
    HW = H * W
    T = _pick_spatial_tile(HW, t_max)
    assert HW % T == 0

    # Free layout change: channels stay put, spatial is flattened onto lanes.
    x = x_nchw.reshape(N, C_in, HW).astype(jnp.float32)
    # PyTorch conv weight (C_mid, C_in, 1, 1) -> (C_mid, C_in) matmul LHS.
    w = conv_w.reshape(C_mid, C_in).astype(jnp.float32)

    grid = (N, HW // T)
    x_spec = pl.BlockSpec((None, C_in, T), lambda n, t: (n, 0, t))
    w_spec = pl.BlockSpec((C_mid, C_in), lambda n, t: (0, 0))
    vmem_limit = 32 * 1024 * 1024   # safe on v5e/v6e (128 MiB) and v7x (64 MiB)

    # ---- Pass 1: ReLU + conv + per-(batch, channel) sum / sum-of-squares ----
    s, ssq = pl.pallas_call(
        relu_conv_stats_kernel,
        out_shape=(
            jax.ShapeDtypeStruct((N, C_mid, 1), jnp.float32),
            jax.ShapeDtypeStruct((N, C_mid, 1), jnp.float32),
        ),
        grid_spec=pltpu.PrefetchScalarGridSpec(
            num_scalar_prefetch=0,
            grid=grid,
            in_specs=[x_spec, w_spec],
            out_specs=[
                pl.BlockSpec((None, C_mid, 1), lambda n, t: (n, 0, 0)),
                pl.BlockSpec((None, C_mid, 1), lambda n, t: (n, 0, 0)),
            ],
        ),
        compiler_params=pltpu.CompilerParams(
            dimension_semantics=("parallel", "arbitrary"),
            vmem_limit_bytes=vmem_limit),
    )(x, w)

    # BatchNorm2d in training mode: biased batch statistics over (N, H, W).
    M = N * HW
    total_sum = jnp.sum(s[:, :, 0], axis=0)                  # (C_mid,)
    total_ssq = jnp.sum(ssq[:, :, 0], axis=0)                # (C_mid,)
    mean = total_sum / M
    # TODO(synk): ssq/M - mean^2 can cancel badly for large, tightly-clustered
    # activations; a shifted / Welford-style accumulation would be more robust.
    var = jnp.maximum(total_ssq / M - mean * mean, 0.0)
    inv_std = gamma.astype(jnp.float32) / jnp.sqrt(var + eps)
    scale = inv_std.reshape(C_mid, 1)
    bias = (beta.astype(jnp.float32) - mean * inv_std).reshape(C_mid, 1)

    # ---- Pass 2: recompute ReLU + conv and apply folded BN (fused) ----------
    out = pl.pallas_call(
        relu_conv_bn_kernel,
        out_shape=jax.ShapeDtypeStruct((N, C_mid, HW), jnp.float32),
        grid_spec=pltpu.PrefetchScalarGridSpec(
            num_scalar_prefetch=0,
            grid=grid,
            in_specs=[
                x_spec,
                w_spec,
                pl.BlockSpec((C_mid, 1), lambda n, t: (0, 0)),
                pl.BlockSpec((C_mid, 1), lambda n, t: (0, 0)),
            ],
            out_specs=pl.BlockSpec((None, C_mid, T), lambda n, t: (n, 0, t)),
        ),
        compiler_params=pltpu.CompilerParams(
            dimension_semantics=("parallel", "parallel"),
            vmem_limit_bytes=vmem_limit),
    )(x, w, scale, bias)

    # PixelShuffle (XLA glue): channel index c_mid = c*r^2 + i*r + j.
    out = out.reshape(N, C_out, r, r, H, W)          # (n, c, i, j, h, w)
    out = jnp.transpose(out, (0, 1, 4, 2, 5, 3))     # (n, c, h, i, w, j)
    return out.reshape(N, C_out, H * r, W * r)       # NCHW, upscaled


if __name__ == "__main__":
    key = jax.random.PRNGKey(0)
    N, C_in, H, W = 2, 4, 16, 16
    upscale_factor = 2
    C_out = 4
    C_mid = C_out * upscale_factor ** 2

    k1, k2 = jax.random.split(key)
    x = jax.random.normal(k1, (N, C_in, H, W), jnp.float32)
    # Deterministic synthetic parameters (shapes from the module's __init__):
    conv_w = jax.random.normal(k2, (C_mid, C_in, 1, 1), jnp.float32) * 0.1
    gamma = jnp.ones((C_mid,), jnp.float32)    # BatchNorm2d default affine init
    beta = jnp.zeros((C_mid,), jnp.float32)

    out = jax.block_until_ready(
        pixel_shuffle_layer(x, conv_w, gamma, beta, upscale_factor)
    )

    # Pure-JAX reference (ReLU -> 1x1 conv -> training-mode BN -> PixelShuffle).
    xr = jnp.maximum(x, 0.0)
    y_ref = jnp.einsum('nchw,oc->nohw', xr, conv_w[:, :, 0, 0])
    mean = y_ref.mean(axis=(0, 2, 3), keepdims=True)
    var = y_ref.var(axis=(0, 2, 3), keepdims=True)
    y_bn = (gamma[None, :, None, None] * (y_ref - mean) / jnp.sqrt(var + 1e-5)
            + beta[None, :, None, None])
    r = upscale_factor
    ref = (y_bn.reshape(N, C_out, r, r, H, W)
               .transpose(0, 1, 4, 2, 5, 3)
               .reshape(N, C_out, H * r, W * r))

    assert out.shape == (N, C_out, H * r, W * r)
    assert jnp.allclose(out, ref, atol=1e-4, rtol=1e-4), "mismatch vs reference"
    print("KERNEL_OK")
</pallas_src>

<mosaic_0001>
module attributes {stable_mosaic.version = 11 : i64} {
  func.func @relu_conv_stats_kernel(%arg0: i32, %arg1: i32, %arg2: memref<1x4x256xf32, #tpu.memory_space<vmem>>, %arg3: memref<16x4xf32, #tpu.memory_space<vmem>>, %arg4: memref<1x16x1xf32, #tpu.memory_space<vmem>>, %arg5: memref<1x16x1xf32, #tpu.memory_space<vmem>>) attributes {dimension_semantics = [#tpu.dimension_semantics<parallel>, #tpu.dimension_semantics<arbitrary>], iteration_bounds = array<i64: 2, 1>, scalar_prefetch = 0 : i64, scratch_operands = 0 : i64, tpu.core_type = #tpu.core_type<tc>, window_params = [{transform_indices = @transform_0, window_bounds = array<i64: 1, 4, 256>}, {pipeline_mode = #tpu.pipeline_mode<synchronous>, transform_indices = @transform_1, window_bounds = array<i64: 16, 4>}, {transform_indices = @transform_2, window_bounds = array<i64: 1, 16, 1>}, {transform_indices = @transform_3, window_bounds = array<i64: 1, 16, 1>}]} {
    %c0_i32 = arith.constant 0 : i32
    %0 = arith.cmpi eq, %arg1, %c0_i32 : i32
    %1 = arith.extui %0 : i1 to i32
    %c0_i32_0 = arith.constant 0 : i32
    %2 = arith.cmpi ne, %1, %c0_i32_0 : i32
    scf.if %2 {
      %cst_20 = arith.constant 0.000000e+00 : f32
      %26 = vector.broadcast %cst_20 : f32 to vector<16x1xf32>
      %c0_21 = arith.constant 0 : index
      %c0_22 = arith.constant 0 : index
      %c0_23 = arith.constant 0 : index
      %27 = vector.load %arg4[%c0_21, %c0_22, %c0_23] : memref<1x16x1xf32, #tpu.memory_space<vmem>>, vector<1x16x1xf32>
      %28 = vector.shape_cast %27 : vector<1x16x1xf32> to vector<16x1xf32>
      %29 = vector.shape_cast %26 : vector<16x1xf32> to vector<1x16x1xf32>
      tpu.vector_store %arg4[%c0_21, %c0_22, %c0_23], %29 {strides = array<i32>} : memref<1x16x1xf32, #tpu.memory_space<vmem>>, vector<1x16x1xf32>,
      %cst_24 = arith.constant 0.000000e+00 : f32
      %30 = vector.broadcast %cst_24 : f32 to vector<16x1xf32>
      %c0_25 = arith.constant 0 : index
      %c0_26 = arith.constant 0 : index
      %c0_27 = arith.constant 0 : index
      %31 = vector.load %arg5[%c0_25, %c0_26, %c0_27] : memref<1x16x1xf32, #tpu.memory_space<vmem>>, vector<1x16x1xf32>
      %32 = vector.shape_cast %31 : vector<1x16x1xf32> to vector<16x1xf32>
      %33 = vector.shape_cast %30 : vector<16x1xf32> to vector<1x16x1xf32>
      tpu.vector_store %arg5[%c0_25, %c0_26, %c0_27], %33 {strides = array<i32>} : memref<1x16x1xf32, #tpu.memory_space<vmem>>, vector<1x16x1xf32>,
    } else {
    }
    %c0 = arith.constant 0 : index
    %c0_1 = arith.constant 0 : index
    %c0_2 = arith.constant 0 : index
    %3 = vector.load %arg2[%c0, %c0_1, %c0_2] : memref<1x4x256xf32, #tpu.memory_space<vmem>>, vector<1x4x256xf32>
    %4 = vector.shape_cast %3 : vector<1x4x256xf32> to vector<4x256xf32>
    %cst = arith.constant 0.000000e+00 : f32
    %5 = vector.broadcast %cst : f32 to vector<4x256xf32>
    %6 = arith.maximumf %4, %5 : vector<4x256xf32>
    %c0_3 = arith.constant 0 : index
    %c0_4 = arith.constant 0 : index
    %7 = vector.load %arg3[%c0_3, %c0_4] : memref<16x4xf32, #tpu.memory_space<vmem>>, vector<16x4xf32>
    %cst_5 = arith.constant dense<0.000000e+00> : vector<16x256xf32>
    %8 = tpu.matmul %7, %6, %cst_5 {dimension_numbers = #tpu.dot_dimension_numbers<[1], [0], [0], [1], [0, 0, 1, 1], [], []>} : vector<16x4xf32>, vector<4x256xf32>, vector<16x256xf32> -> vector<16x256xf32>
    %c0_6 = arith.constant 0 : index
    %c0_7 = arith.constant 0 : index
    %c0_8 = arith.constant 0 : index
    %9 = vector.load %arg4[%c0_6, %c0_7, %c0_8] : memref<1x16x1xf32, #tpu.memory_space<vmem>>, vector<1x16x1xf32>
    %10 = vector.shape_cast %9 : vector<1x16x1xf32> to vector<16x1xf32>
    %cst_9 = arith.constant dense<0.000000e+00> : vector<16xf32>
    %11 = vector.multi_reduction <add>, %8, %cst_9 [1] : vector<16x256xf32> to vector<16xf32>
    %12 = vector.shape_cast %11 : vector<16xf32> to vector<16x1xf32>
    %13 = arith.addf %10, %12 : vector<16x1xf32>
    %c0_10 = arith.constant 0 : index
    %c0_11 = arith.constant 0 : index
    %c0_12 = arith.constant 0 : index
    %14 = vector.load %arg4[%c0_10, %c0_11, %c0_12] : memref<1x16x1xf32, #tpu.memory_space<vmem>>, vector<1x16x1xf32>
    %15 = vector.shape_cast %14 : vector<1x16x1xf32> to vector<16x1xf32>
    %16 = vector.shape_cast %13 : vector<16x1xf32> to vector<1x16x1xf32>
    tpu.vector_store %arg4[%c0_10, %c0_11, %c0_12], %16 {strides = array<i32>} : memref<1x16x1xf32, #tpu.memory_space<vmem>>, vector<1x16x1xf32>,
    %c0_13 = arith.constant 0 : index
    %c0_14 = arith.constant 0 : index
    %c0_15 = arith.constant 0 : index
    %17 = vector.load %arg5[%c0_13, %c0_14, %c0_15] : memref<1x16x1xf32, #tpu.memory_space<vmem>>, vector<1x16x1xf32>
    %18 = vector.shape_cast %17 : vector<1x16x1xf32> to vector<16x1xf32>
    %19 = arith.mulf %8, %8 : vector<16x256xf32>
    %cst_16 = arith.constant dense<0.000000e+00> : vector<16xf32>
    %20 = vector.multi_reduction <add>, %19, %cst_16 [1] : vector<16x256xf32> to vector<16xf32>
    %21 = vector.shape_cast %20 : vector<16xf32> to vector<16x1xf32>
    %22 = arith.addf %18, %21 : vector<16x1xf32>
    %c0_17 = arith.constant 0 : index
    %c0_18 = arith.constant 0 : index
    %c0_19 = arith.constant 0 : index
    %23 = vector.load %arg5[%c0_17, %c0_18, %c0_19] : memref<1x16x1xf32, #tpu.memory_space<vmem>>, vector<1x16x1xf32>
    %24 = vector.shape_cast %23 : vector<1x16x1xf32> to vector<16x1xf32>
    %25 = vector.shape_cast %22 : vector<16x1xf32> to vector<1x16x1xf32>
    tpu.vector_store %arg5[%c0_17, %c0_18, %c0_19], %25 {strides = array<i32>} : memref<1x16x1xf32, #tpu.memory_space<vmem>>, vector<1x16x1xf32>,
    return
  }
  func.func @transform_0(%arg0: i32, %arg1: i32) -> (i32, i32, i32) {
    %c0_i32 = arith.constant 0 : i32
    %c0_i32_0 = arith.constant 0 : i32
    return %arg0, %c0_i32, %arg1 : i32, i32, i32
  }
  func.func @transform_1(%arg0: i32, %arg1: i32) -> (i32, i32) {
    %c0_i32 = arith.constant 0 : i32
    %c0_i32_0 = arith.constant 0 : i32
    %c0_i32_1 = arith.constant 0 : i32
    return %c0_i32, %c0_i32_0 : i32, i32
  }
  func.func @transform_2(%arg0: i32, %arg1: i32) -> (i32, i32, i32) {
    %c0_i32 = arith.constant 0 : i32
    %c0_i32_0 = arith.constant 0 : i32
    %c0_i32_1 = arith.constant 0 : i32
    return %arg0, %c0_i32, %c0_i32_0 : i32, i32, i32
  }
  func.func @transform_3(%arg0: i32, %arg1: i32) -> (i32, i32, i32) {
    %c0_i32 = arith.constant 0 : i32
    %c0_i32_0 = arith.constant 0 : i32
    %c0_i32_1 = arith.constant 0 : i32
    return %arg0, %c0_i32, %c0_i32_0 : i32, i32, i32
  }
}

</mosaic_0001>

<bundles_post_ra>
// kernel: tpu_custom_call.1
= control target key start
LH: loop header
LB: loop body
LE: loop exit
PB: predicated region body
PF: predicated region fallthrough
CT: control target
= control target key end

     0   :  { %s539_s12 = smov 0   ;;  %s541_s13 = smov 0   ;;  %s601_s0 = inlined_call_operand.vmem [shape: f32[2,4,256], index: 0, kind: input, shape index: {}]   ;;  %s602_s1 = inlined_call_operand.vmem [shape: f32[16,4], index: 1, kind: input, shape index: {}]   ;;  %s603_s2 = inlined_call_operand.vmem [shape: f32[2,16,1], index: 2, kind: output, shape index: {0}]   ;;  %s604_s3 = inlined_call_operand.vmem [shape: f32[2,16,1], index: 3, kind: output, shape index: {1}]  }
   0x1   :  { %s543_s14 = smov 0  }
   0x2 LB: > { %s26_s15 = sadd.s32 1, %s512_s13  ;;  %p451_p0 = scmp.ge.s32.totalorder %s516_s14, 1  ;;  %s516_s14 = sphi %s543_s14, %s14_s14   ;;  %s512_s13 = sphi %s541_s13, %s606_s13   ;;  %s508_s12 = sphi %s539_s12, %s605_s12  }
   0x3   : > { %p28_p1 = scmp.ge.s32.totalorder %s26_s15, 2  ;;  %p159_p2 = scmp.lt.s32.totalorder %s516_s14, 3 }
   0x5   : > { %s608_s15 = smov (%p28_p1, %s26_s15), 0  ;;  %p160_p3 = pnand %p451_p0, %p159_p2 }
   0x6   : > { %p193_p4 = scmp.lt.s32.totalorder (!%p160_p3), %s508_s12, 1 }
   0x7   : > { %163 = sbr.rel (%p160_p3) target bundleno = 366 (0x16e), region = 28 }
   0xc   : > { %v518_v0 = vmov 0.0   ;;  %s610_s12 = smov (!%p193_p4, %s508_s12), 1  ;;  %vm234_vm0 = vcmask 1043456   ;;  %v223_v4 = vld [vmem:[%s602_s1] sm:$0xff]  ;;  %vm227_vm1 = vcmask 31744   ;;  %v224_v5 = vld [vmem:[%s602_s1 + $0x8] sm:$0xff] }
   0xd   : > { %303 = vmatprep.mubr.f32.mxu0 %v518_v0  ;;  %309 = vmatprep.mubr.f32.mxu1 %v518_v0  ;;  %s464_s16 = sshll.u32 %s610_s12, 3  ;;  %s465_s24 = sshll.u32 %s610_s12, 4  ;;  %vm216_vm2 = vcmask 7168  }
   0xe   : > { %s200_s19 = scalar_lea.vmem %s601_s0, %s464_s16  ;;  %s573_s27 = scalar_lea.vmem %s603_s2, %s465_s24 }
   0xf   : > { %v221_v1 = vld [vmem:[%s200_s19] sm:$0xff]  ;;  %217 = vst.msk [vmem:[%s573_s27] sm:$0xff] %vm216_vm2, %v518_v0  ;;  %218 = vst.msk [vmem:[%s573_s27 + $0x8] sm:$0xff] %vm216_vm2, %v518_v0  ;;  %s211_s30 = scalar_lea.vmem %s604_s3, %s465_s24 }
  0x10   : > { %v222_v2 = vmax.f32 %v221_v1, 0.0  ;;  %219 = vst.msk [vmem:[%s211_s30] sm:$0xff] %vm216_vm2, %v518_v0  ;;  %220 = vst.msk [vmem:[%s211_s30 + $0x8] sm:$0xff] %vm216_vm2, %v518_v0 }
  0x12   : > { %v226_v3 = vcombine.high %v222_v2, %v222_v2 }
  0x14   : > { %458 = vmatprep.subr.msk.mxu0 %vm234_vm0, %v226_v3  ;;  %467 = vmatprep.subr.msk.mxu1 %vm234_vm0, %v226_v3 }
  0x15   : > { %459 = vmatpush1.msk.msra.mxu0 %vm234_vm0, %v222_v2  ;;  %468 = vmatpush1.msk.msra.mxu1 %vm234_vm0, %v222_v2 }
  0x16   : > { %460 = vmatmul.mubr.msk.f32.vlgmr.msra.gmra.mxu0 %vm227_vm1, %v223_v4  ;;  %461 = vmatmul.mubr.msk.f32.vlgmr.msra.gmra.mxu1 %vm227_vm1, %v224_v5  ;;  %v316_v18 = vld [vmem:[%s573_s27] sm:$0xff]  ;;  %v317_v23 = vld [vmem:[%s573_s27 + $0x8] sm:$0xff] }
  0x17   : > { %v329_v20 = vld [vmem:[%s211_s30] sm:$0xff]  ;;  %v330_v26 = vld [vmem:[%s211_s30 + $0x8] sm:$0xff] }
  0xd6   : > { %v305_v6 = vpop.f32.mrf.mxu0  ;;  %v311_v7 = vpop.f32.mrf.mxu1 }
  0xd7   : > { %v331_v10 = vmul.f32 %v305_v6, %v305_v6  ;;  %v333_v13 = vmul.f32 %v311_v7, %v311_v7 }
  0xd8   : > { %v307_v8 = vpop.f32.mrf.mxu0  ;;  %v313_v9 = vpop.f32.mrf.mxu1 }
  0xd9   : > { %v332_v11 = vmul.f32 %v307_v8, %v307_v8  ;;  %v318_v12 = vadd.f32 %v307_v8, %v305_v6  ;;  %v334_v14 = vmul.f32 %v313_v9, %v313_v9  ;;  %v321_v16 = vadd.f32 %v313_v9, %v311_v7 }
  0xdb   : > { %319 = vadd.xlane.f32.xlu0 %v318_v12  ;;  %v335_v15 = vadd.f32 %v332_v11, %v331_v10  ;;  %v338_v17 = vadd.f32 %v334_v14, %v333_v13 }
  0xdd   : > { %336 = vadd.xlane.f32.xlu1 %v335_v15 }
  0xdf   : > { %322 = vadd.xlane.f32.xlu0 %v321_v16 }
  0xe1   : > { %339 = vadd.xlane.f32.xlu1 %v338_v17 }
 0x164   : > { %v320_v19 = vpop.xlane.xlu0 %319 }
 0x165   : > { %v324_v21 = vadd.f32 %v320_v19, %v316_v18 }
 0x166   : > { %v337_v22 = vpop.xlane.xlu1 %336 }
 0x167   : > { %327 = vst.msk [vmem:[%s573_s27] sm:$0xff] %vm216_vm2, %v324_v21  ;;  %v341_v24 = vadd.f32 %v337_v22, %v329_v20 }
 0x168   : > { %v323_v25 = vpop.xlane.xlu0 %322 }
 0x169   : > { %343 = vst.msk [vmem:[%s211_s30] sm:$0xff] %vm216_vm2, %v341_v24  ;;  %v325_v27 = vadd.f32 %v323_v25, %v317_v23 }
 0x16a   : > { %v340_v28 = vpop.xlane.xlu1 %339 }
 0x16b   : > { %328 = vst.msk [vmem:[%s573_s27 + $0x8] sm:$0xff] %vm216_vm2, %v325_v27  ;;  %v342_v29 = vadd.f32 %v340_v28, %v330_v26 }
 0x16d   : > { %344 = vst.msk [vmem:[%s211_s30 + $0x8] sm:$0xff] %vm216_vm2, %v342_v29 }
 0x16e PF: > { %s14_s14 = sadd.s32 1, %s516_s14   ;;  %s605_s12 = smov %s512_s13 }
 0x16f   : > { %p11_p5 = scmp.ge.s32.totalorder %s14_s14, 4   ;;  %s606_s13 = smov %s608_s15 }
 0x171   :  { %13 = sbr.rel (!%p11_p5) target bundleno = 2 (0x2), region = 74 }

</bundles_post_ra>
